<compile_context>
chip_gen: v6e
topology: v6e:2x2x1
jax: 0.10.0
libtpu: 0.0.40
codegen_flags: <defaults>
</compile_context>

<pallas_src>
import functools

import numpy as np
import jax
import jax.numpy as jnp
from jax.experimental import pallas as pl
from jax.experimental.pallas import tpu as pltpu


def _round_up(x, m):
    return (x + m - 1) // m * m


@functools.lru_cache(maxsize=None)
def _binomial_filter(filt_size):
    """Normalized binomial blur filter (mirrors BlurPool1D.__init__)."""
    table = {
        1: (1.0,),
        2: (1.0, 1.0),
        3: (1.0, 2.0, 1.0),
        4: (1.0, 3.0, 3.0, 1.0),
        5: (1.0, 4.0, 6.0, 4.0, 1.0),
        6: (1.0, 5.0, 10.0, 10.0, 5.0, 1.0),
        7: (1.0, 6.0, 15.0, 20.0, 15.0, 6.0, 1.0),
    }
    a = np.asarray(table[filt_size], dtype=np.float32)
    a = a / a.sum()
    return tuple(float(v) for v in a)


def _blurpool_kernel(x_ref, o_ref, *, filt, stride):
    """out[o, m] = sum_k filt[k] * x_pad[o*stride + k, m]   (VPU weighted sum).

    x_ref: (stride, L_groups, TM) — padded input, deinterleaved by stride phase
           so that x_ref[r, g, m] == x_pad_transposed[g*stride + r, m].
    o_ref: (L_out_al, TM)         — lane-dense output tile.
    """
    l_out = o_ref.shape[0]
    acc = jnp.zeros(o_ref.shape, jnp.float32)
    for k, fk in enumerate(filt):
        q, r = divmod(k, stride)          # o*stride + k == (o+q)*stride + r
        xk = x_ref[r, pl.ds(q, l_out), :].astype(jnp.float32)
        acc = acc + jnp.float32(fk) * xk
    o_ref[...] = acc.astype(o_ref.dtype)


def _pick_row_tile(m, l_in_al, l_out_al, itemsize, budget_bytes=24 * 1024 * 1024):
    """Largest lane tile over N*C whose double-buffered in+out fits the budget."""
    m_lane = _round_up(m, 128)
    for cand in (512, 256, 128):
        if cand <= m_lane and 2 * (l_in_al + l_out_al) * cand * itemsize <= budget_bytes:
            return cand
    # TODO(synk): for extremely long L an extra grid axis over L_out (manual
    # overlapping windows) would be needed to bound VMEM further.
    return 128


def blurpool1d(inp, *, filt_size=3, stride=2, pad_off=0, pad_type="reflect"):
    """BlurPool1D forward. inp: (N, C, L). Returns (N, C, L_out), same dtype."""
    N, C, L = inp.shape
    pad_l = int(1.0 * (filt_size - 1) / 2) + pad_off
    pad_r = int(np.ceil(1.0 * (filt_size - 1) / 2)) + pad_off

    if pad_type in ("refl", "reflect"):
        mode = "reflect"
    elif pad_type in ("repl", "replicate"):
        mode = "edge"
    elif pad_type == "zero":
        mode = "constant"
    else:
        raise ValueError(f"Pad type [{pad_type}] not recognized")

    # filt_size == 1 is pure strided subsampling in the PyTorch module (no conv).
    if filt_size == 1:
        if pad_off == 0:
            return inp[:, :, ::stride]
        return jnp.pad(inp, ((0, 0), (0, 0), (pad_l, pad_r)), mode=mode)[:, :, ::stride]

    # --- glue: reflect/replicate/zero padding along L ---
    if pad_l or pad_r:
        x_pad = jnp.pad(inp, ((0, 0), (0, 0), (pad_l, pad_r)), mode=mode)
    else:
        x_pad = inp

    L_pad = L + pad_l + pad_r
    L_out = (L_pad - filt_size) // stride + 1
    M = N * C
    itemsize = jnp.dtype(inp.dtype).itemsize
    filt = _binomial_filter(filt_size)

    # Aligned sizes: sublane-aligned length axes, lane-dense N*C tiles.
    L_out_al = _round_up(L_out, 8)
    L_groups = _round_up(
        max(pl.cdiv(L_pad, stride), L_out_al + (filt_size - 1) // stride), 8
    )
    L_in_al = L_groups * stride

    tm = _pick_row_tile(M, L_in_al, L_out_al, itemsize)
    M_al = _round_up(M, tm)

    # --- glue (layout plumbing): length-major with N*C on lanes, then
    # deinterleave the padded length axis by the conv stride so the kernel only
    # ever takes contiguous sublane slices.  Zero-padding keeps all kernel
    # reads in-bounds; the padded rows/lanes are sliced off below.
    x_t = jnp.transpose(x_pad, (2, 0, 1)).reshape(L_pad, M)
    x_t = jnp.pad(x_t, ((0, L_in_al - L_pad), (0, M_al - M)))
    x_s = x_t.reshape(L_groups, stride, M_al).transpose(1, 0, 2)  # (stride, Lg, M_al)

    kernel = functools.partial(_blurpool_kernel, filt=filt, stride=stride)

    out_t = pl.pallas_call(
        kernel,
        out_shape=jax.ShapeDtypeStruct((L_out_al, M_al), inp.dtype),
        grid=(M_al // tm,),
        in_specs=[pl.BlockSpec((stride, L_groups, tm), lambda i: (0, 0, i))],
        out_specs=pl.BlockSpec((L_out_al, tm), lambda i: (0, i)),
        compiler_params=pltpu.CompilerParams(
            dimension_semantics=("parallel",),
            vmem_limit_bytes=48 * 1024 * 1024,
        ),
        cost_estimate=pl.CostEstimate(
            flops=int(2 * M * L_out * filt_size),
            transcendentals=0,
            bytes_accessed=int((M * L_pad + M * L_out) * itemsize),
        ),
    )(x_s)

    # --- glue: drop alignment padding and restore NCL layout ---
    return out_t[:L_out, :M].transpose(1, 0).reshape(N, C, L_out)


if __name__ == "__main__":
    key = jax.random.PRNGKey(0)
    N, C, L = 2, 4, 16  # small NCL input
    x = jax.random.normal(key, (N, C, L), dtype=jnp.float32)

    out = blurpool1d(x, filt_size=3, stride=2, pad_off=0, pad_type="reflect")
    out = jax.block_until_ready(out)

    # sanity check against a pure-JAX reference of the same semantics
    filt = jnp.asarray(_binomial_filter(3), dtype=jnp.float32)
    x_pad = jnp.pad(x, ((0, 0), (0, 0), (1, 1)), mode="reflect")
    L_out = out.shape[-1]
    ref = sum(filt[k] * x_pad[:, :, k : k + 2 * L_out : 2] for k in range(3))

    assert out.shape == (N, C, (L + 2 - 3) // 2 + 1)
    np.testing.assert_allclose(np.asarray(out), np.asarray(ref), rtol=1e-5, atol=1e-5)

    print("KERNEL_OK")
</pallas_src>

<mosaic_0001>
module attributes {stable_mosaic.version = 11 : i64} {
  func.func @_blurpool_kernel(%arg0: i32, %arg1: memref<2x16x128xf32, #tpu.memory_space<vmem>>, %arg2: memref<8x128xf32, #tpu.memory_space<vmem>>) attributes {dimension_semantics = [#tpu.dimension_semantics<parallel>], iteration_bounds = array<i64: 1>, scalar_prefetch = 0 : i64, scratch_operands = 0 : i64, tpu.core_type = #tpu.core_type<tc>, window_params = [{transform_indices = @transform_0, window_bounds = array<i64: 2, 16, 128>}, {transform_indices = @transform_1, window_bounds = array<i64: 8, 128>}]} {
    %cst = arith.constant 0.000000e+00 : f32
    %0 = vector.broadcast %cst : f32 to vector<8x128xf32>
    %c0 = arith.constant 0 : index
    %c0_0 = arith.constant 0 : index
    %c0_1 = arith.constant 0 : index
    %1 = vector.load %arg1[%c0, %c0_0, %c0_1] : memref<2x16x128xf32, #tpu.memory_space<vmem>>, vector<1x8x128xf32>
    %2 = vector.shape_cast %1 : vector<1x8x128xf32> to vector<8x128xf32>
    %cst_2 = arith.constant 2.500000e-01 : f32
    %3 = vector.broadcast %cst_2 : f32 to vector<8x128xf32>
    %4 = arith.mulf %3, %2 : vector<8x128xf32>
    %5 = arith.addf %0, %4 : vector<8x128xf32>
    %c1 = arith.constant 1 : index
    %c0_3 = arith.constant 0 : index
    %c0_4 = arith.constant 0 : index
    %6 = vector.load %arg1[%c1, %c0_3, %c0_4] : memref<2x16x128xf32, #tpu.memory_space<vmem>>, vector<1x8x128xf32>
    %7 = vector.shape_cast %6 : vector<1x8x128xf32> to vector<8x128xf32>
    %cst_5 = arith.constant 5.000000e-01 : f32
    %8 = vector.broadcast %cst_5 : f32 to vector<8x128xf32>
    %9 = arith.mulf %8, %7 : vector<8x128xf32>
    %10 = arith.addf %5, %9 : vector<8x128xf32>
    %c0_6 = arith.constant 0 : index
    %c1_7 = arith.constant 1 : index
    %c0_8 = arith.constant 0 : index
    %11 = vector.load %arg1[%c0_6, %c1_7, %c0_8] : memref<2x16x128xf32, #tpu.memory_space<vmem>>, vector<1x8x128xf32>
    %12 = vector.shape_cast %11 : vector<1x8x128xf32> to vector<8x128xf32>
    %cst_9 = arith.constant 2.500000e-01 : f32
    %13 = vector.broadcast %cst_9 : f32 to vector<8x128xf32>
    %14 = arith.mulf %13, %12 : vector<8x128xf32>
    %15 = arith.addf %10, %14 : vector<8x128xf32>
    %c0_10 = arith.constant 0 : index
    %c0_11 = arith.constant 0 : index
    %16 = vector.load %arg2[%c0_10, %c0_11] : memref<8x128xf32, #tpu.memory_space<vmem>>, vector<8x128xf32>
    tpu.vector_store %arg2[%c0_10, %c0_11], %15 {strides = array<i32>} : memref<8x128xf32, #tpu.memory_space<vmem>>, vector<8x128xf32>,
    return
  }
  func.func @transform_0(%arg0: i32) -> (i32, i32, i32) {
    %c0_i32 = arith.constant 0 : i32
    %c0_i32_0 = arith.constant 0 : i32
    %c0_i32_1 = arith.constant 0 : i32
    return %c0_i32, %c0_i32_0, %arg0 : i32, i32, i32
  }
  func.func @transform_1(%arg0: i32) -> (i32, i32) {
    %c0_i32 = arith.constant 0 : i32
    %c0_i32_0 = arith.constant 0 : i32
    return %c0_i32, %arg0 : i32, i32
  }
}

</mosaic_0001>

<bundles_post_ra>
// kernel: tpu_custom_call.1
= control target key start
LH: loop header
LB: loop body
LE: loop exit
PB: predicated region body
PF: predicated region fallthrough
CT: control target
= control target key end

     0   :  { %6 = vsyncpa [#allocation3], 0  ;;  %s117_s0 = inlined_call_operand.hbm [shape: f32[2,16,128], index: 0, kind: input, shape index: {}]   ;;  %s118_s1 = inlined_call_operand.hbm [shape: f32[8,128], index: 1, kind: output, shape index: {}]  }
   0x1   :  { %7 = vsyncpa [#allocation4], 0  ;;  %s97_s6 = smov [#allocation2]  }
   0x2   :  { %s13_s7 = sshll.u32 %s97_s6, 4  ;;  %s14_s7 = int_to_ptr.vmem [resolvable:$true] %s13_s7 }
   0x3   :  { %s61_s8 = scalar_lea.vmem %s14_s7, 512  ;;  %p66_p1 = scmp.lt.s32.totalorder %s14_s7, %s14_s7 }
   0x4   :  { %p62_p0 = scmp.ne.s32.totalorder %s14_s7, %s61_s8  ;;  %p67_p2 = scmp.lt.s32.totalorder %s61_s8, %s61_s8 }
   0x6   :  { %p68_p3 = por %p67_p2, %p66_p1 }
   0x8   :  { %p69_p4 = pnand %p68_p3, %p62_p0 }
   0xa   :  { %72 = shalt.err (!%p69_p4)
}
   0xb   :  { %s98_s9 = smov 128   ;;  %s99_s10 = smov 8  }
   0xc   :  { %19 = dma.hbm_to_vmem [thread:$0]  %s117_s0, 512, %s14_s7, [#allocation3], %s98_s9, %s98_s9, %s99_s10  }
   0xd   :  { %93 = dma.done.wait [#allocation3], 512  }
   0xe   :  { %94 = vsyncadd [#allocation3], 4294966784  ;;  %v23_v0 = vld [vmem:[#allocation2] sm:$0xff]  ;;  %v27_v1 = vld [vmem:[#allocation2 + $0x10] sm:$0xff]  ;;  %s100_s13 = smov [#allocation5]  }
   0xf   :  { %v30_v2 = vld [vmem:[#allocation2 + $0x1] sm:$0xff]  ;;  %v24_v3 = vmul.f32 0.25, %v23_v0  ;;  %v28_v4 = vmul.f32 0.5, %v27_v1  ;;  %s40_s14 = sshll.u32 %s100_s13, 4  ;;  %s41_s14 = int_to_ptr.vmem [resolvable:$true] %s40_s14 }
  0x10   :  { %v31_v5 = vmul.f32 0.25, %v30_v2  ;;  %s73_s15 = scalar_lea.vmem %s41_s14, 128  ;;  %p78_p6 = scmp.lt.s32.totalorder %s41_s14, %s41_s14 }
  0x11   :  { %v29_v6 = vadd.f32 %v28_v4, %v24_v3  ;;  %p74_p5 = scmp.ne.s32.totalorder %s41_s14, %s73_s15  ;;  %p79_p7 = scmp.lt.s32.totalorder %s73_s15, %s73_s15 }
  0x13   :  { %v32_v7 = vadd.f32 %v31_v5, %v29_v6  ;;  %p80_p8 = por %p79_p7, %p78_p6 }
  0x15   :  { %33 = vst [vmem:[#allocation5] sm:$0xff] %v32_v7  ;;  %p81_p9 = pnand %p80_p8, %p74_p5 }
  0x17   :  { %84 = shalt.err (!%p81_p9)
}
  0x18   :  { %43 = dma.vmem_to_hbm [thread:$0]  %s41_s14, 128, %s118_s1, [#allocation4]  }
  0x19   :  { %95 = dma.done.wait [#allocation4], 128  }
  0x1a   :  { %96 = vsyncadd [#allocation4], 4294967168 }
  0x1b   :  { %47 = vsyncpa [#allocation3], 1 }
  0x1c   :  { %48 = vsyncpa [#allocation4], 1 }

</bundles_post_ra>
